<compile_context>
chip_gen: v7x
topology: tpu7x:2x2x1
jax: 0.10.0
libtpu: 0.0.40
codegen_flags: <defaults>
</compile_context>

<pallas_src>
import math

import jax
import jax.numpy as jnp
from jax.experimental import pallas as pl
from jax.experimental.pallas import tpu as pltpu

EPS = 1e-5


def _round_up(n, m):
    return ((n + m - 1) // m) * m


def _vmem_capacity_bytes():
    # Generation-aware VMEM capacity (v5e/v6e: 128 MiB, v7x: 64 MiB per TC).
    try:
        return int(pltpu.get_tpu_info().vmem_capacity_bytes)
    except Exception:
        return 64 * 1024 * 1024  # safe floor for every current generation


def fuse_pre_layernorm_linear_params(gamma, beta, w, wb, *, matmul_dtype=jnp.bfloat16):
    """Fold the LayerNorm affine into the Linear layer (exact, in f32).

    (xn * gamma + beta) @ w + wb == xn @ (gamma[:, None] * w) + (beta @ w + wb)

    Call once per weight update; keep it out of the per-step hot path.
    """
    gamma_f32 = gamma.astype(jnp.float32)
    beta_f32 = beta.astype(jnp.float32)
    w_f32 = w.astype(jnp.float32)
    w_fused = (gamma_f32[:, None] * w_f32).astype(matmul_dtype)
    b_fused = (beta_f32 @ w_f32 + wb.astype(jnp.float32)).reshape(1, -1)
    return w_fused, b_fused


def _pre_ln_linear_kernel(x_ref, w_ref, b_ref, o_ref, xn_ref):
    # Grid: (row blocks [parallel], weight column blocks [arbitrary, innermost]).
    j = pl.program_id(1)

    @pl.when(j == 0)
    def _():
        # LayerNorm over the last dim, single-pass statistics in f32
        # (biased variance, eps inside rsqrt — PyTorch nn.LayerNorm semantics).
        x = x_ref[...].astype(jnp.float32)
        inv_d = 1.0 / x.shape[-1]
        mean = jnp.sum(x, axis=-1, keepdims=True) * inv_d
        mean_sq = jnp.sum(x * x, axis=-1, keepdims=True) * inv_d
        var = mean_sq - mean * mean
        xn = (x - mean) * jax.lax.rsqrt(var + EPS)
        # gamma is folded into w, beta / linear bias into b (wrapper), so the
        # fused fn below is just:  out = xn @ w_fused + b_fused.
        xn_ref[...] = xn.astype(xn_ref.dtype)

    out = jnp.dot(xn_ref[...], w_ref[...], preferred_element_type=jnp.float32)
    out = out + b_ref[...].astype(jnp.float32)
    o_ref[...] = out.astype(o_ref.dtype)


def pre_layer_norm_linear(x, w_fused, b_fused, *, block_rows=512, block_cols=None,
                          out_dtype=None):
    """Fused PreLayerNorm(dim, Linear(D, Dout)) forward with pre-folded params.

    x: (..., D); w_fused: (D, Dout); b_fused: (1, Dout). Returns (..., Dout).
    Keep D / Dout multiples of 128 for lane-dense stores and full MXU tiles.
    """
    *lead, D = x.shape
    Dout = w_fused.shape[-1]
    N = math.prod(lead) if lead else 1
    out_dtype = x.dtype if out_dtype is None else out_dtype

    x2 = x.reshape(N, D)

    x_isz = x2.dtype.itemsize
    mm_isz = w_fused.dtype.itemsize
    out_isz = jnp.dtype(out_dtype).itemsize

    # --- tile planning -------------------------------------------------------
    row_align = 8 if x_isz >= 4 else 16
    br = min(block_rows, _round_up(N, row_align))
    br = max(row_align, _round_up(br, row_align))
    # Keep at least 2 row-grid steps when possible so the "parallel" axis can
    # actually shard across v7x's two TensorCores (harmless on v5e/v6e).
    if N > row_align:
        br = min(br, _round_up(-(-N // 2), row_align))

    if block_cols is None:
        tn = Dout
    else:
        tn = max(128, _round_up(min(block_cols, Dout), 128))
    if Dout % 128 != 0:
        tn = Dout  # non-lane-aligned output dim: block must span the full dim

    vmem_cap = _vmem_capacity_bytes()
    vmem_budget = max(vmem_cap - (8 << 20), 16 << 20)

    def needed(br_, tn_):
        nc_ = -(-Dout // tn_)
        w_bufs = 1 if nc_ == 1 else 2
        return (
            2 * br_ * D * x_isz            # input tiles (double-buffered)
            + br_ * D * mm_isz             # xn scratch (matmul dtype)
            + 4 * br_ * D * 4              # f32 elementwise temporaries in LN
            + w_bufs * D * tn_ * mm_isz    # weight column tiles
            + 2 * br_ * tn_ * out_isz      # output tiles (double-buffered)
            + br_ * tn_ * 4                # f32 matmul accumulator
            + 2 * 2 * tn_ * 4              # bias tiles
            + (2 << 20)                    # misc headroom
        )

    # Shrink the column tile first (keeps row tiles large), then the row tile.
    while needed(br, tn) > vmem_budget:
        if Dout % 128 == 0 and tn > 512:
            tn = max(512, _round_up(tn // 2, 128))
        elif br > row_align:
            br = max(row_align, _round_up(br // 2, row_align))
        elif Dout % 128 == 0 and tn > 128:
            tn = max(128, _round_up(tn // 2, 128))
        else:
            break

    nr = -(-N // br)
    nc = -(-Dout // tn)
    grid = (nr, nc)

    vmem_limit = int(min(vmem_cap - (2 << 20), max(needed(br, tn), 32 << 20)))

    cost = pl.CostEstimate(
        flops=2 * N * D * Dout,
        transcendentals=N,  # one rsqrt per row
        bytes_accessed=(N * D * x_isz + D * Dout * mm_isz + Dout * 4
                        + N * Dout * out_isz),
    )

    if nc == 1:
        # Constant across the grid -> single-buffered to halve VMEM residency.
        w_spec = pl.BlockSpec((D, tn), lambda i, j: (0, j), pipeline_mode=pl.Buffered(1))
        b_spec = pl.BlockSpec((1, tn), lambda i, j: (0, j), pipeline_mode=pl.Buffered(1))
    else:
        w_spec = pl.BlockSpec((D, tn), lambda i, j: (0, j))
        b_spec = pl.BlockSpec((1, tn), lambda i, j: (0, j))

    out2 = pl.pallas_call(
        _pre_ln_linear_kernel,
        out_shape=jax.ShapeDtypeStruct((N, Dout), out_dtype),
        grid_spec=pltpu.PrefetchScalarGridSpec(
            num_scalar_prefetch=0,
            grid=grid,
            in_specs=[
                pl.BlockSpec((br, D), lambda i, j: (i, 0)),  # x row tile
                w_spec,
                b_spec,
            ],
            out_specs=pl.BlockSpec((br, tn), lambda i, j: (i, j)),
            scratch_shapes=[pltpu.VMEM((br, D), w_fused.dtype)],
        ),
        compiler_params=pltpu.CompilerParams(
            dimension_semantics=("parallel", "arbitrary"),
            vmem_limit_bytes=vmem_limit,
        ),
        cost_estimate=cost,
    )(x2, w_fused, b_fused)

    return out2.reshape(*lead, Dout)


def pre_layer_norm(x, gamma, beta, w, wb, *, matmul_dtype=jnp.bfloat16, **kwargs):
    """Convenience path: folds parameters, then runs the fused kernel.

    Prefer fuse_pre_layernorm_linear_params(...) + pre_layer_norm_linear(...)
    so the fold runs once per weight update instead of once per call.
    """
    w_fused, b_fused = fuse_pre_layernorm_linear_params(
        gamma, beta, w, wb, matmul_dtype=matmul_dtype)
    return pre_layer_norm_linear(x, w_fused, b_fused, **kwargs)


if __name__ == "__main__":
    # Small but lane-dense shapes: D a multiple of 128 keeps stores unmasked
    # and the MXU N dimension full.
    B, S, D = 2, 16, 128

    key = jax.random.PRNGKey(0)
    kx, kg, kb, kw, kwb = jax.random.split(key, 5)

    x = jax.random.normal(kx, (B, S, D), dtype=jnp.float32)

    # Non-trivial LayerNorm affine parameters (exercise the gamma/beta fold).
    gamma = 1.0 + 0.1 * jax.random.normal(kg, (D,), dtype=jnp.float32)
    beta = 0.1 * jax.random.normal(kb, (D,), dtype=jnp.float32)

    # fn = Linear(D, D), deterministic init.
    w = jax.random.normal(kw, (D, D), dtype=jnp.float32) * (1.0 / jnp.sqrt(D))
    wb = jax.random.normal(kwb, (D,), dtype=jnp.float32) * 0.01

    # Fold once (outside the hot path), then run the fused kernel.
    w_fused, b_fused = fuse_pre_layernorm_linear_params(
        gamma, beta, w, wb, matmul_dtype=jnp.bfloat16)
    out = jax.block_until_ready(
        pre_layer_norm_linear(x, w_fused, b_fused, block_rows=512))

    # Pure-JAX reference with PyTorch LayerNorm semantics (f32, unfolded order).
    mean = jnp.mean(x, axis=-1, keepdims=True)
    var = jnp.mean((x - mean) ** 2, axis=-1, keepdims=True)
    xn = (x - mean) / jnp.sqrt(var + EPS)
    ref = (xn * gamma + beta) @ w + wb

    assert out.shape == ref.shape, "shape mismatch vs reference"
    # Loose tolerance: the kernel runs the matmul on the bf16 MXU path.
    assert jnp.allclose(out, ref, atol=3e-2, rtol=3e-2), "mismatch vs f32 reference"

    # Tighter parity against the same bf16-rounded operands (f32 accumulation).
    xn_bf = xn.astype(jnp.bfloat16).astype(jnp.float32)
    ref_bf = xn_bf @ w_fused.astype(jnp.float32) + b_fused
    assert jnp.allclose(out, ref_bf, atol=1e-2, rtol=1e-2), "mismatch vs bf16 reference"

    print("KERNEL_OK")
</pallas_src>

<mosaic_0001>
module attributes {stable_mosaic.version = 11 : i64} {
  func.func @_pre_ln_linear_kernel(%arg0: i32, %arg1: i32, %arg2: memref<16x128xf32, #tpu.memory_space<vmem>>, %arg3: memref<128x128xbf16, #tpu.memory_space<vmem>>, %arg4: memref<1x128xf32, #tpu.memory_space<vmem>>, %arg5: memref<16x128xf32, #tpu.memory_space<vmem>>, %arg6: memref<16x128xbf16, #tpu.memory_space<vmem>>) attributes {dimension_semantics = [#tpu.dimension_semantics<parallel>, #tpu.dimension_semantics<arbitrary>], iteration_bounds = array<i64: 2, 1>, scalar_prefetch = 0 : i64, scratch_operands = 1 : i64, tpu.core_type = #tpu.core_type<tc>, window_params = [{transform_indices = @transform_0, window_bounds = array<i64: 16, 128>}, {pipeline_mode = #tpu.pipeline_mode<synchronous>, transform_indices = @transform_1, window_bounds = array<i64: 128, 128>}, {pipeline_mode = #tpu.pipeline_mode<synchronous>, transform_indices = @transform_2, window_bounds = array<i64: 1, 128>}, {transform_indices = @transform_3, window_bounds = array<i64: 16, 128>}]} {
    %c0_i32 = arith.constant 0 : i32
    %0 = arith.cmpi eq, %arg1, %c0_i32 : i32
    %1 = arith.extui %0 : i1 to i32
    %c0_i32_0 = arith.constant 0 : i32
    %2 = arith.cmpi ne, %1, %c0_i32_0 : i32
    scf.if %2 {
      %c0_8 = arith.constant 0 : index
      %c0_9 = arith.constant 0 : index
      %10 = vector.load %arg2[%c0_8, %c0_9] : memref<16x128xf32, #tpu.memory_space<vmem>>, vector<16x128xf32>
      %cst_10 = arith.constant dense<0.000000e+00> : vector<16xf32>
      %11 = vector.multi_reduction <add>, %10, %cst_10 [1] : vector<16x128xf32> to vector<16xf32>
      %12 = vector.shape_cast %11 : vector<16xf32> to vector<16x1xf32>
      %cst_11 = arith.constant 7.812500e-03 : f32
      %13 = vector.broadcast %cst_11 : f32 to vector<16x1xf32>
      %14 = arith.mulf %12, %13 : vector<16x1xf32>
      %15 = arith.mulf %10, %10 : vector<16x128xf32>
      %cst_12 = arith.constant dense<0.000000e+00> : vector<16xf32>
      %16 = vector.multi_reduction <add>, %15, %cst_12 [1] : vector<16x128xf32> to vector<16xf32>
      %17 = vector.shape_cast %16 : vector<16xf32> to vector<16x1xf32>
      %cst_13 = arith.constant 7.812500e-03 : f32
      %18 = vector.broadcast %cst_13 : f32 to vector<16x1xf32>
      %19 = arith.mulf %17, %18 : vector<16x1xf32>
      %20 = arith.mulf %14, %14 : vector<16x1xf32>
      %21 = arith.subf %19, %20 : vector<16x1xf32>
      %22 = vector.broadcast %14 : vector<16x1xf32> to vector<16x128xf32>
      %23 = arith.subf %10, %22 : vector<16x128xf32>
      %cst_14 = arith.constant 9.99999974E-6 : f32
      %24 = vector.broadcast %cst_14 : f32 to vector<16x1xf32>
      %25 = arith.addf %21, %24 : vector<16x1xf32>
      %26 = math.rsqrt %25 : vector<16x1xf32>
      %27 = vector.broadcast %26 : vector<16x1xf32> to vector<16x128xf32>
      %28 = arith.mulf %23, %27 : vector<16x128xf32>
      %29 = arith.truncf %28 : vector<16x128xf32> to vector<16x128xbf16>
      %c0_15 = arith.constant 0 : index
      %c0_16 = arith.constant 0 : index
      %30 = vector.load %arg6[%c0_15, %c0_16] : memref<16x128xbf16, #tpu.memory_space<vmem>>, vector<16x128xbf16>
      tpu.vector_store %arg6[%c0_15, %c0_16], %29 {strides = array<i32>} : memref<16x128xbf16, #tpu.memory_space<vmem>>, vector<16x128xbf16>,
    } else {
    }
    %c0 = arith.constant 0 : index
    %c0_1 = arith.constant 0 : index
    %3 = vector.load %arg6[%c0, %c0_1] : memref<16x128xbf16, #tpu.memory_space<vmem>>, vector<16x128xbf16>
    %c0_2 = arith.constant 0 : index
    %c0_3 = arith.constant 0 : index
    %4 = vector.load %arg3[%c0_2, %c0_3] : memref<128x128xbf16, #tpu.memory_space<vmem>>, vector<128x128xbf16>
    %cst = arith.constant dense<0.000000e+00> : vector<16x128xf32>
    %5 = tpu.matmul %3, %4, %cst {dimension_numbers = #tpu.dot_dimension_numbers<[1], [0], [0], [1], [0, 0, 1, 1], [], []>} : vector<16x128xbf16>, vector<128x128xbf16>, vector<16x128xf32> -> vector<16x128xf32>
    %c0_4 = arith.constant 0 : index
    %c0_5 = arith.constant 0 : index
    %6 = vector.load %arg4[%c0_4, %c0_5] : memref<1x128xf32, #tpu.memory_space<vmem>>, vector<1x128xf32>
    %7 = vector.broadcast %6 : vector<1x128xf32> to vector<16x128xf32>
    %8 = arith.addf %5, %7 : vector<16x128xf32>
    %c0_6 = arith.constant 0 : index
    %c0_7 = arith.constant 0 : index
    %9 = vector.load %arg5[%c0_6, %c0_7] : memref<16x128xf32, #tpu.memory_space<vmem>>, vector<16x128xf32>
    tpu.vector_store %arg5[%c0_6, %c0_7], %8 {strides = array<i32>} : memref<16x128xf32, #tpu.memory_space<vmem>>, vector<16x128xf32>,
    return
  }
  func.func @transform_0(%arg0: i32, %arg1: i32) -> (i32, i32) {
    %c0_i32 = arith.constant 0 : i32
    %c0_i32_0 = arith.constant 0 : i32
    return %arg0, %c0_i32 : i32, i32
  }
  func.func @transform_1(%arg0: i32, %arg1: i32) -> (i32, i32) {
    %c0_i32 = arith.constant 0 : i32
    %c0_i32_0 = arith.constant 0 : i32
    return %c0_i32, %arg1 : i32, i32
  }
  func.func @transform_2(%arg0: i32, %arg1: i32) -> (i32, i32) {
    %c0_i32 = arith.constant 0 : i32
    %c0_i32_0 = arith.constant 0 : i32
    return %c0_i32, %arg1 : i32, i32
  }
  func.func @transform_3(%arg0: i32, %arg1: i32) -> (i32, i32) {
    %c0_i32 = arith.constant 0 : i32
    return %arg0, %arg1 : i32, i32
  }
}

</mosaic_0001>

<bundles_post_ra>
// kernel: tpu_custom_call.1
= control target key start
LH: loop header
LB: loop body
LE: loop exit
PB: predicated region body
PF: predicated region fallthrough
CT: control target
= control target key end

     0   :  { %8 = vsyncpa [#allocation4], 0  ;;  %s1067_s0 = inlined_call_operand.hbm [shape: f32[32,128], index: 0, kind: input, shape index: {}]   ;;  %s1068_s1 = inlined_call_operand.hbm [shape: bf16[128,128], index: 1, kind: input, shape index: {}]   ;;  %s1069_s2 = inlined_call_operand.vmem [shape: f32[1,128], index: 2, kind: input, shape index: {}]   ;;  %s1070_s3 = inlined_call_operand.hbm [shape: f32[32,128], index: 3, kind: output, shape index: {}]  }
   0x1   :  { %10 = vsyncpa [#allocation4 + $0x1], 0 }
   0x2   :  { %11 = vsyncpa [#allocation7], 0 }
   0x3   :  { %12 = vsyncpa [#allocation5], 0 }
   0x4   :  { %14 = vsyncpa [#allocation5 + $0x1], 0  ;;  %s841_s12 = smov 0   ;;  %s843_s13 = smov 0  }
   0x5   :  { %s845_s14 = smov 0   ;;  %s847_s15 = smov 0  }
   0x6   :  { %s849_s16 = smov 0   ;;  %s851_s17 = smov 0  }
   0x7 LB: > { %s513_s18 = sadd.s32 4294967295, %s808_s17   ;;  %s514_s19 = sadd.s32 4294967294, %s808_s17   ;;  %s808_s17 = sphi %s851_s17, %s20_s17   ;;  %s804_s16 = sphi %s849_s16, %s1094_s16   ;;  %s800_s15 = sphi %s847_s15, %s1093_s15   ;;  %s796_s14 = sphi %s845_s14, %s1092_s14   ;;  %s792_s13 = sphi %s843_s13, %s1091_s13   ;;  %s788_s12 = sphi %s841_s12, %s1090_s12  }
   0x8   : > { %p52_p0 = scmp.ne.s32.totalorder %s792_s13, %s788_s12  ;;  %p875_p1 = scmp.eq.s32.totalorder %s513_s18, 0 }
   0x9   : > { %p879_p2 = scmp.eq.s32.totalorder %s513_s18, 1  ;;  %p136_p3 = scmp.eq.s32.totalorder %s514_s19, 1 }
   0xa   : > { %s1075_s20 = scalar_select %p875_p1, 1, 0 }
   0xb   : > { %s1076_s21 = scalar_select %p879_p2, 1, 0 }
   0xc   : > { %p885_p4 = por %p875_p1, %p52_p0  ;;  %p515_p5 = scmp.ge.s32.totalorder %s808_s17, 1 }
   0xd   : > { %p890_p6 = por %p136_p3, %p52_p0  ;;  %p143_p7 = scmp.lt.s32.totalorder %s808_s17, 3 }
   0xe   : > { %s1077_s22 = scalar_select %p885_p4, 1, 0 }
   0xf   : > { %s1078_s23 = scalar_select %p890_p6, 1, 0 }
  0x10   : > { %p895_p8 = pnand %p515_p5, %p143_p7  ;;  %s810_s25 = smov [#allocation6]  }
  0x11   : > { %s157_s26 = sshll.u32 %s810_s25, 4  ;;  %s32_s28 = sadd.s32 1, %s804_s16  ;;  %s158_s26 = int_to_ptr.vmem [resolvable:$true] %s157_s26 }
  0x12   : > { %s1079_s24 = scalar_select %p895_p8, 1, 0 }
  0x13   : > { %p579_p9 = pneg %p895_p8  ;;  %s664_s4 = scalar_lea.hbm %s1068_s1, 1024 }
  0x14   : > { %p665_p12 = scmp.ne.s32.totalorder %s1068_s1, %s664_s4  ;;  %p671_p5 = scmp.lt.u32.totalorder %s664_s4, %s1068_s1 }
  0x15   : > { %p904_p11 = pnand %p579_p9, %p875_p1 }
  0x17   : > { %p666_p13 = pneg %p904_p11 }
  0x19   : > { %p667_p0 = pnand %p666_p13, %p665_p12 }
  0x1b   : > { %p668_p3 = pneg %p667_p0 }
  0x1d   : > { %p673_p7 = pnand %p671_p5, %p668_p3 }
  0x1f   : > { %676 = shalt.err (!%p673_p7)
}
  0x20   : > { %s677_s9 = scalar_lea.vmem %s158_s26, 1024  ;;  %p685_p1 = scmp.lt.s32.totalorder %s158_s26, %s158_s26 }
  0x21   : > { %p678_p9 = scmp.ne.s32.totalorder %s158_s26, %s677_s9  ;;  %p686_p4 = scmp.lt.s32.totalorder %s677_s9, %s677_s9 }
  0x23   : > { %p680_p10 = pnand %p678_p9, %p666_p13  ;;  %p687_p8 = por %p686_p4, %p685_p1 }
  0x25   : > { %p681_p6 = pneg %p680_p10 }
  0x27   : > { %p688_p2 = pnand %p687_p8, %p681_p6 }
  0x29   : > { %691 = shalt.err (!%p688_p2)
}
  0x2a   : > { %s811_s10 = smov 64   ;;  %s812_s11 = smov 4  }
  0x2b   : > { %582 = dma.hbm_to_vmem [thread:$0]  (!%p904_p11), %s1068_s1, 1024, %s158_s26, [#allocation7], %s811_s10, %s811_s10, %s812_s11  }
  0x2c   : > { %p34_p1 = scmp.ge.s32.totalorder %s32_s28, 2  ;;  %s39_s25 = sadd.s32 1, %s796_s14 }
  0x2d   : > { %p46_p2 = scmp.ne.s32.totalorder %s796_s14, %s792_s13  ;;  %p47_p4 = scmp.eq.s32.totalorder %s808_s17, 0 }
  0x2e   : > { %s1096_s28 = smov (%p34_p1, %s32_s28), 0  ;;  %p1082_p8 = scmp.ne.s32.totalorder %s1076_s21, 0 }
  0x2f   : > { %p931_p6 = por %p47_p4, %p46_p2  ;;  %s36_s27 = ssub.s32 %s804_s16, %s1096_s28 }
  0x30   : > { %p937_p10 = por %p1082_p8, %p46_p2  ;;  %p592_p12 = scmp.lt.s32.totalorder %s808_s17, 2 }
  0x31   : > { %p37_p11 = scmp.eq.s32.totalorder %s36_s27, 0  ;;  %s177_s26 = sand.u32 1, %s796_s14  }
  0x32   : > { %s519_s4 = sshll.u32 %s177_s26, 4  ;;  %s540_s6 = sshll.u32 %s804_s16, 8 }
  0x33   : > { %s946_s5 = scalar_select %p37_p11, %s796_s14, %s39_s25  }
  0x34   : > { %s952_s9 = scalar_lea.hbm %s1067_s0, %s540_s6  ;;  %s181_s21 = scalar_lea.vmem [#allocation3], %s519_s4 }
  0x35   : > { %s188_s10 = sshll.u32 %s181_s21, 4  ;;  %p958_p13 = pnand %p592_p12, %p931_p6  ;;  %s954_s10 = int_to_ptr.vmem [resolvable:$true] %s188_s10 }
  0x36   : > { %s962_s18 = scalar_lea.sflag [#allocation4], %s177_s26  ;;  %s692_s19 = scalar_lea.hbm %s952_s9, 256 }
  0x37   : > { %p693_p0 = scmp.ne.s32.totalorder %s952_s9, %s692_s19  ;;  %p694_p3 = pneg %p958_p13 }
  0x38   : > { %s697_s29 = scalar_lea.hbm %s1067_s0, 512  ;;  %p698_p9 = scmp.lt.u32.totalorder %s952_s9, %s1067_s0 }
  0x39   : > { %p695_p5 = pnand %p694_p3, %p693_p0  ;;  %p699_p1 = scmp.lt.u32.totalorder %s697_s29, %s692_s19 }
  0x3a   : > { %p701_p4 = scmp.lt.u32.totalorder %s692_s19, %s952_s9 }
  0x3b   : > { %p696_p7 = pneg %p695_p5  ;;  %p700_p2 = por %p699_p1, %p698_p9 }
  0x3d   : > { %p702_p6 = por %p701_p4, %p700_p2 }
  0x3f   : > { %p703_p8 = pnand %p702_p6, %p696_p7 }
  0x41   : > { %706 = shalt.err (!%p703_p8)
}
  0x42   : > { %s707_s26 = scalar_lea.vmem %s954_s10, 256  ;;  %s813_s7 = smov [#allocation3]  }
  0x43   : > { %p708_p12 = scmp.ne.s32.totalorder %s954_s10, %s707_s26  ;;  %s712_s8 = sshll.u32 %s813_s7, 4  ;;  %s713_s8 = int_to_ptr.vmem [resolvable:$false] %s712_s8 }
  0x44   : > { %s714_s21 = scalar_lea.vmem %s713_s8, 512  ;;  %p715_p5 = scmp.lt.s32.totalorder %s954_s10, %s713_s8 }
  0x45   : > { %p710_p11 = pnand %p708_p12, %p694_p3  ;;  %p716_p9 = scmp.lt.s32.totalorder %s714_s21, %s707_s26 }
  0x47   : > { %p711_p0 = pneg %p710_p11  ;;  %p717_p1 = por %p716_p9, %p715_p5 }
  0x49   : > { %p718_p2 = pnand %p717_p1, %p711_p0 }
  0x4b   : > { %721 = shalt.err (!%p718_p2)
}
  0x4c   : > { %s814_s19 = smov 128   ;;  %s815_s25 = smov 8  }
  0x4d   : > { %586 = dma.hbm_to_vmem [thread:$0]  (!%p958_p13), %s952_s9, 256, %s954_s10, %s962_s18, %s814_s19, %s814_s19, %s815_s25  }
  0x4e   : > { %p1085_p3 = scmp.ne.s32.totalorder %s1079_s24, 0 }
  0x4f   : > { %s993_s27 = sand.u32 (!%p1085_p3), 1, %s792_s13   ;;  %p1086_p7 = scmp.ne.s32.totalorder (!%p1085_p3), %s1077_s22, 0 }
  0x50   : > { %200 = sbr.rel (%p1085_p3) target bundleno = 492 (0x1ec), region = 32  ;;  %s523_s29 = sshll.u32 (!%p1085_p3), %s993_s27, 4 }
  0x51   : > { %s203_s4 = scalar_lea.sflag (!%p1085_p3), [#allocation4], %s993_s27  ;;  %s206_s6 = scalar_lea.vmem (!%p1085_p3), [#allocation3], %s523_s29 }
  0x57   : > { %775 = dma.done.wait (%p1086_p7), %s203_s4, 256  }
  0x58   : > { %777 = vsyncadd (%p1086_p7), %s203_s4, 4294967040  ;;  %p1087_p13 = scmp.ne.s32.totalorder %s1075_s20, 0 }
  0x5a   : > { %779 = dma.done.wait (%p1087_p13), [#allocation7], 1024  }
  0x5b   : > { %781 = vsyncadd (%p1087_p13), [#allocation7], 4294966272  ;;  %v816_v0 = vmov 0.0   ;;  %v246_v1 = vld [vmem:[%s206_s6] sm:$0xff]  ;;  %v247_v2 = vld [vmem:[%s206_s6 + $0x8] sm:$0xff]  ;;  %vm817_vm0 = vmmov 0  }
  0x5c   : > { %551 = vmatprep.subr.bf16.mxu0 %v816_v0  ;;  %248 = vadd.xlane.f32.xlu0 %v246_v1  ;;  %v254_v3 = vmul.f32 %v246_v1, %v246_v1  ;;  %v652_v4 = vld [vmem:[#allocation6] sm:$0xff]   ;;  %v255_v5 = vmul.f32 %v247_v2, %v247_v2  ;;  %v653_v6 = vld [vmem:[#allocation6 + $0x8] sm:$0xff]   ;;  %v654_v7 = vld [vmem:[#allocation6 + $0x10] sm:$0xff]   ;;  %s235_s24 = scalar_lea.vmem [#allocation8], %s523_s29  ;;  %s541_s10 = sshll.u32 %s800_s15, 8 }
  0x5d   : > { %552 = vmatpush3.bf16.msra.mxu0 %v652_v4  ;;  %v655_v8 = vld [vmem:[#allocation6 + $0x18] sm:$0xff]   ;;  %v656_v9 = vld [vmem:[#allocation6 + $0x20] sm:$0xff]   ;;  %v657_v10 = vld [vmem:[#allocation6 + $0x28] sm:$0xff]   ;;  %567 = vmatprep.mubr.msk.bf16.mxu0 %vm817_vm0, %v816_v0  ;;  %s406_s9 = sshll.u32 %s235_s24, 4  ;;  %s1018_s26 = scalar_lea.hbm %s1070_s3, %s541_s10  ;;  %s1013_s9 = int_to_ptr.vmem [resolvable:$true] %s406_s9 }
  0x5e   : > { %256 = vadd.xlane.f32.xlu1 %v254_v3  ;;  %553 = vmatprep.subr.bf16.mxu0 %v816_v0  ;;  %v658_v11 = vld [vmem:[#allocation6 + $0x30] sm:$0xff]   ;;  %v659_v12 = vld [vmem:[#allocation6 + $0x38] sm:$0xff]   ;;  %v526_v34 = vld [vmem:[%s1069_s2] ss:$0 sm:$0xff]  ;;  %s392_s7 = scalar_lea.sflag [#allocation5], %s993_s27  ;;  %s722_s15 = scalar_lea.vmem %s1013_s9, 256 }
  0x5f   : > { %p723_p4 = scmp.ne.s32.totalorder %s1013_s9, %s722_s15  ;;  %s818_s8 = smov [#allocation8]  }
  0x60   : > { %250 = vadd.xlane.f32.xlu0 %v247_v2  ;;  %s726_s21 = sshll.u32 %s818_s8, 4  ;;  %s727_s21 = int_to_ptr.vmem [resolvable:$false] %s726_s21 }
  0x61   : > { %554 = vmatpush3.bf16.msra.mxu0 %v653_v6  ;;  %p724_p6 = pnand %p723_p4, %p937_p10  ;;  %s728_s19 = scalar_lea.vmem %s727_s21, 512 }
  0x62   : > { %258 = vadd.xlane.f32.xlu1 %v255_v5  ;;  %555 = vmatprep.subr.bf16.mxu0 %v816_v0  ;;  %p729_p12 = scmp.lt.s32.totalorder %s1013_s9, %s727_s21  ;;  %p730_p11 = scmp.lt.s32.totalorder %s728_s19, %s722_s15 }
  0x63   : > { %p725_p8 = pneg %p724_p6 }
  0x64   : > { %p731_p0 = por %p730_p11, %p729_p12 }
  0x65   : > { %556 = vmatpush3.bf16.msra.mxu0 %v654_v7 }
  0x66   : > { %557 = vmatprep.subr.bf16.mxu0 %v816_v0  ;;  %p732_p5 = pnand %p731_p0, %p725_p8 }
  0x69   : > { %558 = vmatpush3.bf16.msra.mxu0 %v655_v8 }
  0x6a   : > { %559 = vmatprep.subr.bf16.mxu0 %v816_v0 }
  0x6d   : > { %560 = vmatpush3.bf16.msra.mxu0 %v656_v9 }
  0x6e   : > { %561 = vmatprep.subr.bf16.mxu0 %v816_v0 }
  0x71   : > { %562 = vmatpush3.bf16.msra.mxu0 %v657_v10 }
  0x72   : > { %563 = vmatprep.subr.bf16.mxu0 %v816_v0 }
  0x75   : > { %564 = vmatpush3.bf16.msra.mxu0 %v658_v11 }
  0x76   : > { %565 = vmatprep.subr.bf16.mxu0 %v816_v0 }
  0x79   : > { %566 = vmatpush3.bf16.msra.mxu0 %v659_v12 }
  0xe9   : > { %v249_v13 = vpop.xlane.xlu0 %248 }
  0xea   : > { %v252_v14 = vmul.f32 0.0078125, %v249_v13 }
  0xeb   : > { %v257_v15 = vpop.xlane.xlu1 %256 }
  0xec   : > { %v262_v16 = vmul.f32 %v252_v14, %v252_v14  ;;  %v260_v17 = vmul.f32 0.0078125, %v257_v15  ;;  %v266_v28 = vsub.f32 %v246_v1, %v252_v14 }
  0xed   : > { %v251_v18 = vpop.xlane.xlu0 %250 }
  0xee   : > { %v264_v19 = vsub.f32 %v260_v17, %v262_v16  ;;  %v253_v20 = vmul.f32 0.0078125, %v251_v18 }
  0xef   : > { %v259_v21 = vpop.xlane.xlu1 %258 }
  0xf0   : > { %v268_v22 = vadd.f32 1e-05, %v264_v19  ;;  %v263_v23 = vmul.f32 %v253_v20, %v253_v20  ;;  %v261_v24 = vmul.f32 0.0078125, %v259_v21  ;;  %v267_v29 = vsub.f32 %v247_v2, %v253_v20 }
  0xf2   : > { %v265_v25 = vsub.f32 %v261_v24, %v263_v23  ;;  %660 = vrsqrt.f32 %v268_v22 }
  0xf4   : > { %v269_v26 = vadd.f32 1e-05, %v265_v25 }
  0xf6   : > { %662 = vrsqrt.f32 %v269_v26 }
  0xfc   : > { %v661_v27 = vpop.eup %660 }
  0xfd   : > { %v272_v31 = vmul.f32 %v661_v27, %v266_v28 }
 0x100   : > { %v663_v30 = vpop.eup %662 }
 0x101   : > { %v273_v32 = vmul.f32 %v663_v30, %v267_v29 }
 0x103   : > { %v274_v33 = vpack.c.bf16 %v273_v32, %v272_v31 }
 0x105   : > { %568 = vmatmul.mubr.bf16.vlgmr.msra.gmra.mrb[0].mxu0 %v274_v33 }
 0x1d8   : > { %v382_v35 = vpop.f32.mrb[0].mxu0 }
 0x1d9   : > { %v383_v36 = vadd.f32 %v526_v34, %v382_v35  ;;  %v569_v37 = vpop.f32.mrb[1].mxu0 }
 0x1da   : > { %v385_v38 = vpop.f32.mrb[2].mxu0 }
 0x1db   : > { %389 = vst [vmem:[%s235_s24] sm:$0xff] %v383_v36  ;;  %v386_v39 = vadd.f32 %v526_v34, %v385_v38  ;;  %v570_v40 = vpop.f32.mrb[3].mxu0 }
 0x1dd   : > { %390 = vst [vmem:[%s235_s24 + $0x8] sm:$0xff] %v386_v39 }
 0x1de   : > { %735 = shalt.err (!%p732_p5)
}
 0x1df   : > { %s736_s25 = scalar_lea.hbm %s1018_s26, 256  ;;  %s740_s6 = scalar_lea.hbm %s1070_s3, 512 }
 0x1e0   : > { %p737_p9 = scmp.ne.s32.totalorder %s1018_s26, %s736_s25  ;;  %p741_p3 = scmp.lt.u32.totalorder %s1018_s26, %s1070_s3 }
 0x1e1   : > { %p742_p7 = scmp.lt.u32.totalorder %s740_s6, %s736_s25  ;;  %p744_p4 = scmp.lt.u32.totalorder %s736_s25, %s1018_s26 }
 0x1e2   : > { %p738_p1 = pnand %p737_p9, %p937_p10 }
 0x1e3   : > { %p743_p13 = por %p742_p7, %p741_p3 }
 0x1e4   : > { %p739_p2 = pneg %p738_p1 }
 0x1e5   : > { %p745_p6 = por %p744_p4, %p743_p13 }
 0x1e7   : > { %p746_p8 = pnand %p745_p6, %p739_p2 }
 0x1e9   : > { %749 = shalt.err (!%p746_p8)
}
 0x1ea   : > { %s819_s24 = smov 128   ;;  %s820_s10 = smov 8  }
 0x1eb   : > { %577 = dma.vmem_to_hbm [thread:$0]  (%p937_p10), %s1013_s9, 256, %s1018_s26, %s392_s7, %s819_s24, %s819_s24, %s820_s10  }
 0x1ec PF: > { %s421_s11 = sand.u32 1, %s788_s12   ;;  %p1088_p12 = scmp.ne.s32.totalorder %s1078_s23, 0 }
 0x1ed   : > { %p1089_p11 = scmp.ge.s32.totalorder %s808_s17, 2  ;;  %s422_s18 = scalar_lea.sflag [#allocation5], %s421_s11 }
 0x1ef   : > { %p588_p0 = pnand %p1089_p11, %p1088_p12 }
 0x1f1   : > { %783 = dma.done.wait (!%p588_p0), %s422_s18, 256  }
 0x1f2   : > { %785 = vsyncadd (!%p588_p0), %s422_s18, 4294967040  ;;  %s20_s17 = sadd.s32 1, %s808_s17   ;;  %s1090_s12 = smov %s792_s13 }
 0x1f3   : > { %p17_p5 = scmp.ge.s32.totalorder %s20_s17, 4   ;;  %s1091_s13 = smov %s796_s14 }
 0x1f4   : > { %s1092_s14 = smov %s946_s5  ;;  %s1093_s15 = smov %s804_s16 }
 0x1f5   : > { %s1094_s16 = smov %s1096_s28  ;;  %19 = sbr.rel (!%p17_p5) target bundleno = 7 (0x7), region = 89 }
 0x1fc   :  { %427 = vsyncpa [#allocation4], 1 }
 0x1fd   :  { %429 = vsyncpa [#allocation4 + $0x1], 1 }
 0x1fe   :  { %430 = vsyncpa [#allocation7], 1 }
 0x1ff   :  { %431 = vsyncpa [#allocation5], 1 }
 0x200   :  { %433 = vsyncpa [#allocation5 + $0x1], 1 }

</bundles_post_ra>
